<compile_context>
chip_gen: v7x
topology: tpu7x:2x2x1
jax: 0.10.0
libtpu: 0.0.40
codegen_flags: <defaults>
</compile_context>

<pallas_src>
import functools

import jax
import jax.numpy as jnp
from jax.experimental import pallas as pl
from jax.experimental.pallas import tpu as pltpu

HIDDEN = 256   # matches the v6e/v7x 256x256 MXU tile; 4x 128x128 passes on v5e
LANE = 128
BIAS_W = 3 * HIDDEN + LANE   # packed bias slab width (b1|b2|b22|b3_padded)


def _round_up(x, m):
    return (x + m - 1) // m * m


def _cdiv(a, b):
    return (a + b - 1) // b


def _choose_tile(batch, tm_max):
    """Pick the batch tile size.

    Tiny batches -> one grid step (lowest fixed overhead on all chips).
    Larger batches -> an even number of balanced tiles, each <= tm_max, so the
    "parallel" grid axis splits evenly across v7x's two TensorCores.
    """
    b8 = _round_up(batch, 8)
    if b8 <= 256:                       # deployment / latency path
        return b8
    n_tiles = max(2, 2 * _cdiv(b8, 2 * tm_max))   # even tile count
    return _round_up(_cdiv(b8, n_tiles), 8)


def _actor_kernel(ma_ref, x_ref, w1_ref, wh_ref, w3_ref, b_ref, out_ref):
    """One batch tile of the fused 4-layer MLP.

    wh_ref packs [w2_t | w22_t] along the lane axis; b_ref packs
    [b1 | b2 | b22 | b3_padded] (all f32).  All slices below are static and
    lane-aligned (multiples of 128).
    """
    max_action = ma_ref[0, 0]            # SMEM scalar
    wdt = w1_ref.dtype                   # f32 or bf16 (MXU input dtype)
    H = HIDDEN

    # l1 + relu
    a = jnp.dot(x_ref[...].astype(wdt), w1_ref[...],
                preferred_element_type=jnp.float32) + b_ref[:, 0:H]
    a = jnp.maximum(a, 0.0)

    # l2 + relu
    a = jnp.dot(a.astype(wdt), wh_ref[:, 0:H],
                preferred_element_type=jnp.float32) + b_ref[:, H:2 * H]
    a = jnp.maximum(a, 0.0)

    # l2_2 + relu
    a = jnp.dot(a.astype(wdt), wh_ref[:, H:2 * H],
                preferred_element_type=jnp.float32) + b_ref[:, 2 * H:3 * H]
    a = jnp.maximum(a, 0.0)

    # l3 + tanh (EUP), scaled by max_action; elementwise stays f32
    a = jnp.dot(a.astype(wdt), w3_ref[...],
                preferred_element_type=jnp.float32) + b_ref[:, 3 * H:3 * H + LANE]
    out_ref[...] = (max_action * jnp.tanh(a)).astype(out_ref.dtype)


@functools.partial(jax.jit, static_argnames=("action_dim", "tm"))
def actor_forward(state, params, max_action, action_dim, *, tm=2048):
    """state: (B, state_dim) f32.  params: packed dict from init_actor_params."""
    B, state_dim = state.shape

    TM = _choose_tile(B, tm)
    grid = (pl.cdiv(B, TM),)

    # Weights/biases: constant index_map -> fetched once, VMEM-resident.
    rep = lambda shape: pl.BlockSpec(shape, lambda i: (0, 0))
    # State/output: tiled along the batch axis, software-pipelined; the partial
    # last block (if any) is clipped by Pallas.
    tile = lambda shape: pl.BlockSpec(shape, lambda i: (i, 0))

    ma = jnp.asarray(max_action, jnp.float32).reshape(1, 1)

    out = pl.pallas_call(
        _actor_kernel,
        out_shape=jax.ShapeDtypeStruct((B, LANE), jnp.float32),
        grid=grid,
        in_specs=[
            pl.BlockSpec(memory_space=pltpu.MemorySpace.SMEM),   # max_action
            tile((TM, state_dim)),                               # state
            rep((state_dim, HIDDEN)),                            # w1_t
            rep((HIDDEN, 2 * HIDDEN)),                           # [w2_t|w22_t]
            rep((HIDDEN, LANE)),                                 # w3_t (padded)
            rep((1, BIAS_W)),                                    # packed biases
        ],
        out_specs=tile((TM, LANE)),
        compiler_params=pltpu.CompilerParams(
            dimension_semantics=("parallel",),   # shard batch tiles across v7x TCs
            vmem_limit_bytes=16 << 20,
        ),
    )(
        ma, state,
        params["w1_t"], params["wh_t"], params["w3_t"], params["b"],
    )

    return out[:, :action_dim]


def init_actor_params(key, state_dim, action_dim, weight_dtype=jnp.bfloat16):
    """PyTorch-Linear-like uniform fan-in init, stored in the packed layout.

    Weights are pre-transposed ((in, out) so the kernel computes x @ w_t + b,
    identical to torch's x @ W.T + b), w2/w2_2 are concatenated along the lane
    axis, l3's weight/bias are pre-padded to the 128-lane width, and all biases
    are packed into one f32 slab.  Weights may be bf16 (default, native MXU
    dtype on v6e/v7x) or f32; biases stay f32.
    """
    ks = jax.random.split(key, 8)

    def linear(kw, kb, fan_in, fan_out):
        bound = 1.0 / jnp.sqrt(jnp.float32(fan_in))
        w_t = jax.random.uniform(kw, (fan_in, fan_out), jnp.float32, -bound, bound)
        b = jax.random.uniform(kb, (1, fan_out), jnp.float32, -bound, bound)
        return w_t, b

    w1_t, b1 = linear(ks[0], ks[1], state_dim, HIDDEN)
    w2_t, b2 = linear(ks[2], ks[3], HIDDEN, HIDDEN)
    w22_t, b22 = linear(ks[4], ks[5], HIDDEN, HIDDEN)
    w3_t, b3 = linear(ks[6], ks[7], HIDDEN, action_dim)

    # Pre-pad l3 to the lane width once (no per-call pads in the forward).
    w3_pad = jnp.zeros((HIDDEN, LANE), jnp.float32).at[:, :action_dim].set(w3_t)
    b3_pad = jnp.zeros((1, LANE), jnp.float32).at[:, :action_dim].set(b3)

    return dict(
        w1_t=w1_t.astype(weight_dtype),
        wh_t=jnp.concatenate([w2_t, w22_t], axis=1).astype(weight_dtype),
        w3_t=w3_pad.astype(weight_dtype),
        b=jnp.concatenate([b1, b2, b22, b3_pad], axis=1),   # f32, (1, 896)
    )


def actor_reference(state, params, max_action, action_dim):
    """Pure-JAX f32 reference (matches the PyTorch forward)."""
    H = HIDDEN
    w1 = params["w1_t"].astype(jnp.float32)
    wh = params["wh_t"].astype(jnp.float32)
    w3 = params["w3_t"].astype(jnp.float32)[:, :action_dim]
    b = params["b"]
    b1, b2, b22 = b[:, 0:H], b[:, H:2 * H], b[:, 2 * H:3 * H]
    b3 = b[:, 3 * H:3 * H + action_dim]
    a = jnp.maximum(state @ w1 + b1, 0.0)
    a = jnp.maximum(a @ wh[:, 0:H] + b2, 0.0)
    a = jnp.maximum(a @ wh[:, H:2 * H] + b22, 0.0)
    return max_action * jnp.tanh(a @ w3 + b3)


if __name__ == "__main__":
    key = jax.random.PRNGKey(0)
    k_params, k_state, k_big = jax.random.split(key, 3)

    batch = 4
    state_dim = 16      # small MuJoCo-like observation dim
    action_dim = 6      # small MuJoCo-like action dim
    max_action = 1.0

    params_f32 = init_actor_params(k_params, state_dim, action_dim,
                                   weight_dtype=jnp.float32)
    state = jax.random.normal(k_state, (batch, state_dim), jnp.float32)

    # --- tiny-batch (deployment-like) run, f32 weights, single grid step ---
    out = jax.block_until_ready(actor_forward(state, params_f32, max_action,
                                              action_dim))
    ref = actor_reference(state, params_f32, max_action, action_dim)
    assert out.shape == (batch, action_dim)
    assert jnp.allclose(out, ref, atol=1e-5, rtol=1e-5), (
        f"max abs diff {jnp.max(jnp.abs(out - ref))}")

    # --- larger batch: 2 balanced tiles (304 rows each), partial last block ---
    big_state = jax.random.normal(k_big, (600, state_dim), jnp.float32)
    out_big = jax.block_until_ready(actor_forward(big_state, params_f32,
                                                  max_action, action_dim))
    ref_big = actor_reference(big_state, params_f32, max_action, action_dim)
    assert out_big.shape == (600, action_dim)
    assert jnp.allclose(out_big, ref_big, atol=1e-4, rtol=1e-4), (
        f"max abs diff {jnp.max(jnp.abs(out_big - ref_big))}")

    # --- default bf16 weights (native v6e/v7x MXU dtype, halves weight DMA) ---
    params_bf16 = init_actor_params(k_params, state_dim, action_dim)
    out_bf16 = jax.block_until_ready(actor_forward(state, params_bf16,
                                                   max_action, action_dim))
    # loose tolerance: bf16 weights/activations between layers, f32 accumulation,
    # output bounded by tanh
    assert jnp.allclose(out_bf16, ref, atol=1e-1, rtol=1e-1), (
        f"max abs diff {jnp.max(jnp.abs(out_bf16 - ref))}")

    print("KERNEL_OK")
</pallas_src>

<mosaic_0001>
module attributes {stable_mosaic.version = 11 : i64} {
  func.func @_actor_kernel(%arg0: i32, %arg1: memref<1x1xf32, #tpu.memory_space<smem>>, %arg2: memref<8x16xf32, #tpu.memory_space<vmem>>, %arg3: memref<16x256xf32, #tpu.memory_space<vmem>>, %arg4: memref<256x512xf32, #tpu.memory_space<vmem>>, %arg5: memref<256x128xf32, #tpu.memory_space<vmem>>, %arg6: memref<1x896xf32, #tpu.memory_space<vmem>>, %arg7: memref<8x128xf32, #tpu.memory_space<vmem>>) attributes {dimension_semantics = [#tpu.dimension_semantics<parallel>], iteration_bounds = array<i64: 1>, scalar_prefetch = 0 : i64, scratch_operands = 0 : i64, tpu.core_type = #tpu.core_type<tc>, window_params = [{transform_indices = @transform_0, window_bounds = array<i64: 1, 1>}, {transform_indices = @transform_1, window_bounds = array<i64: 8, 16>}, {pipeline_mode = #tpu.pipeline_mode<synchronous>, transform_indices = @transform_2, window_bounds = array<i64: 16, 256>}, {pipeline_mode = #tpu.pipeline_mode<synchronous>, transform_indices = @transform_3, window_bounds = array<i64: 256, 512>}, {pipeline_mode = #tpu.pipeline_mode<synchronous>, transform_indices = @transform_4, window_bounds = array<i64: 256, 128>}, {pipeline_mode = #tpu.pipeline_mode<synchronous>, transform_indices = @transform_5, window_bounds = array<i64: 1, 896>}, {transform_indices = @transform_6, window_bounds = array<i64: 8, 128>}]} {
    %c0 = arith.constant 0 : index
    %c0_0 = arith.constant 0 : index
    %0 = memref.load %arg1[%c0, %c0_0] : memref<1x1xf32, #tpu.memory_space<smem>>
    %c0_1 = arith.constant 0 : index
    %c0_2 = arith.constant 0 : index
    %1 = vector.load %arg2[%c0_1, %c0_2] : memref<8x16xf32, #tpu.memory_space<vmem>>, vector<8x16xf32>
    %c0_3 = arith.constant 0 : index
    %c0_4 = arith.constant 0 : index
    %2 = vector.load %arg3[%c0_3, %c0_4] : memref<16x256xf32, #tpu.memory_space<vmem>>, vector<16x256xf32>
    %cst = arith.constant dense<0.000000e+00> : vector<8x256xf32>
    %3 = tpu.matmul %1, %2, %cst {dimension_numbers = #tpu.dot_dimension_numbers<[1], [0], [0], [1], [0, 0, 1, 1], [], []>} : vector<8x16xf32>, vector<16x256xf32>, vector<8x256xf32> -> vector<8x256xf32>
    %c0_5 = arith.constant 0 : index
    %c0_6 = arith.constant 0 : index
    %4 = vector.load %arg6[%c0_5, %c0_6] : memref<1x896xf32, #tpu.memory_space<vmem>>, vector<1x256xf32>
    %5 = vector.broadcast %4 : vector<1x256xf32> to vector<8x256xf32>
    %6 = arith.addf %3, %5 : vector<8x256xf32>
    %cst_7 = arith.constant 0.000000e+00 : f32
    %7 = vector.broadcast %cst_7 : f32 to vector<8x256xf32>
    %8 = arith.maximumf %6, %7 : vector<8x256xf32>
    %c0_8 = arith.constant 0 : index
    %c0_9 = arith.constant 0 : index
    %9 = vector.load %arg4[%c0_8, %c0_9] : memref<256x512xf32, #tpu.memory_space<vmem>>, vector<256x256xf32>
    %cst_10 = arith.constant dense<0.000000e+00> : vector<8x256xf32>
    %10 = tpu.matmul %8, %9, %cst_10 {dimension_numbers = #tpu.dot_dimension_numbers<[1], [0], [0], [1], [0, 0, 1, 1], [], []>} : vector<8x256xf32>, vector<256x256xf32>, vector<8x256xf32> -> vector<8x256xf32>
    %c0_11 = arith.constant 0 : index
    %c256 = arith.constant 256 : index
    %11 = vector.load %arg6[%c0_11, %c256] : memref<1x896xf32, #tpu.memory_space<vmem>>, vector<1x256xf32>
    %12 = vector.broadcast %11 : vector<1x256xf32> to vector<8x256xf32>
    %13 = arith.addf %10, %12 : vector<8x256xf32>
    %cst_12 = arith.constant 0.000000e+00 : f32
    %14 = vector.broadcast %cst_12 : f32 to vector<8x256xf32>
    %15 = arith.maximumf %13, %14 : vector<8x256xf32>
    %c0_13 = arith.constant 0 : index
    %c256_14 = arith.constant 256 : index
    %16 = vector.load %arg4[%c0_13, %c256_14] : memref<256x512xf32, #tpu.memory_space<vmem>>, vector<256x256xf32>
    %cst_15 = arith.constant dense<0.000000e+00> : vector<8x256xf32>
    %17 = tpu.matmul %15, %16, %cst_15 {dimension_numbers = #tpu.dot_dimension_numbers<[1], [0], [0], [1], [0, 0, 1, 1], [], []>} : vector<8x256xf32>, vector<256x256xf32>, vector<8x256xf32> -> vector<8x256xf32>
    %c0_16 = arith.constant 0 : index
    %c512 = arith.constant 512 : index
    %18 = vector.load %arg6[%c0_16, %c512] : memref<1x896xf32, #tpu.memory_space<vmem>>, vector<1x256xf32>
    %19 = vector.broadcast %18 : vector<1x256xf32> to vector<8x256xf32>
    %20 = arith.addf %17, %19 : vector<8x256xf32>
    %cst_17 = arith.constant 0.000000e+00 : f32
    %21 = vector.broadcast %cst_17 : f32 to vector<8x256xf32>
    %22 = arith.maximumf %20, %21 : vector<8x256xf32>
    %c0_18 = arith.constant 0 : index
    %c0_19 = arith.constant 0 : index
    %23 = vector.load %arg5[%c0_18, %c0_19] : memref<256x128xf32, #tpu.memory_space<vmem>>, vector<256x128xf32>
    %cst_20 = arith.constant dense<0.000000e+00> : vector<8x128xf32>
    %24 = tpu.matmul %22, %23, %cst_20 {dimension_numbers = #tpu.dot_dimension_numbers<[1], [0], [0], [1], [0, 0, 1, 1], [], []>} : vector<8x256xf32>, vector<256x128xf32>, vector<8x128xf32> -> vector<8x128xf32>
    %c0_21 = arith.constant 0 : index
    %c768 = arith.constant 768 : index
    %25 = vector.load %arg6[%c0_21, %c768] : memref<1x896xf32, #tpu.memory_space<vmem>>, vector<1x128xf32>
    %26 = vector.broadcast %25 : vector<1x128xf32> to vector<8x128xf32>
    %27 = arith.addf %24, %26 : vector<8x128xf32>
    %28 = math.tanh %27 : vector<8x128xf32>
    %29 = vector.broadcast %0 : f32 to vector<8x128xf32>
    %30 = arith.mulf %29, %28 : vector<8x128xf32>
    %c0_22 = arith.constant 0 : index
    %c0_23 = arith.constant 0 : index
    %31 = vector.load %arg7[%c0_22, %c0_23] : memref<8x128xf32, #tpu.memory_space<vmem>>, vector<8x128xf32>
    tpu.vector_store %arg7[%c0_22, %c0_23], %30 {strides = array<i32>} : memref<8x128xf32, #tpu.memory_space<vmem>>, vector<8x128xf32>,
    return
  }
  func.func @transform_0(%arg0: i32) -> (i32, i32) {
    %c0_i32 = arith.constant 0 : i32
    %c0_i32_0 = arith.constant 0 : i32
    %c0_i32_1 = arith.constant 0 : i32
    return %c0_i32, %c0_i32_0 : i32, i32
  }
  func.func @transform_1(%arg0: i32) -> (i32, i32) {
    %c0_i32 = arith.constant 0 : i32
    %c0_i32_0 = arith.constant 0 : i32
    return %arg0, %c0_i32 : i32, i32
  }
  func.func @transform_2(%arg0: i32) -> (i32, i32) {
    %c0_i32 = arith.constant 0 : i32
    %c0_i32_0 = arith.constant 0 : i32
    %c0_i32_1 = arith.constant 0 : i32
    return %c0_i32, %c0_i32_0 : i32, i32
  }
  func.func @transform_3(%arg0: i32) -> (i32, i32) {
    %c0_i32 = arith.constant 0 : i32
    %c0_i32_0 = arith.constant 0 : i32
    %c0_i32_1 = arith.constant 0 : i32
    return %c0_i32, %c0_i32_0 : i32, i32
  }
  func.func @transform_4(%arg0: i32) -> (i32, i32) {
    %c0_i32 = arith.constant 0 : i32
    %c0_i32_0 = arith.constant 0 : i32
    %c0_i32_1 = arith.constant 0 : i32
    return %c0_i32, %c0_i32_0 : i32, i32
  }
  func.func @transform_5(%arg0: i32) -> (i32, i32) {
    %c0_i32 = arith.constant 0 : i32
    %c0_i32_0 = arith.constant 0 : i32
    %c0_i32_1 = arith.constant 0 : i32
    return %c0_i32, %c0_i32_0 : i32, i32
  }
  func.func @transform_6(%arg0: i32) -> (i32, i32) {
    %c0_i32 = arith.constant 0 : i32
    %c0_i32_0 = arith.constant 0 : i32
    return %arg0, %c0_i32 : i32, i32
  }
}

</mosaic_0001>

<bundles_post_ra>
// kernel: actor_forward.1
= control target key start
LH: loop header
LB: loop body
LE: loop exit
PB: predicated region body
PF: predicated region fallthrough
CT: control target
= control target key end

     0   :  { %12 = vsyncpa [#allocation4], 0  ;;  %s1024_s0 = inlined_call_operand.<no memory space> [shape: f32[1,1], index: 0, kind: input, shape index: {}]   ;;  %s1025_s1 = inlined_call_operand.vmem [shape: f32[4,16], index: 1, kind: input, shape index: {}]   ;;  %s1026_s2 = inlined_call_operand.hbm [shape: f32[16,256], index: 2, kind: input, shape index: {}]   ;;  %s1027_s3 = inlined_call_operand.hbm [shape: f32[256,512], index: 3, kind: input, shape index: {}]   ;;  %s1028_s4 = inlined_call_operand.hbm [shape: f32[256,128], index: 4, kind: input, shape index: {}]   ;;  %s1029_s5 = inlined_call_operand.vmem [shape: f32[1,896], index: 5, kind: input, shape index: {}]   ;;  %s1030_s6 = inlined_call_operand.hbm [shape: f32[4,128], index: 6, kind: output, shape index: {}]  }
   0x1   :  { %13 = vsyncpa [#allocation7], 0 }
   0x2   :  { %14 = vsyncpa [#allocation5], 0  ;;  %s900_s21 = smov [#allocation6]   ;;  %s806_s25 = scalar_lea.hbm %s1027_s3, 16384 }
   0x3   :  { %s36_s22 = sshll.u32 %s900_s21, 4  ;;  %p807_p0 = scmp.ne.s32.totalorder %s1027_s3, %s806_s25  ;;  %s37_s22 = int_to_ptr.vmem [resolvable:$true] %s36_s22 }
   0x4   :  { %p810_p1 = scmp.lt.u32.totalorder %s806_s25, %s1027_s3 }
   0x6   :  { %p812_p2 = pnand %p810_p1, %p807_p0 }
   0x8   :  { %815 = shalt.err (!%p812_p2)
}
   0x9   :  { %s816_s30 = scalar_lea.vmem %s37_s22, 16384  ;;  %p821_p4 = scmp.lt.s32.totalorder %s37_s22, %s37_s22 }
   0xa   :  { %p817_p3 = scmp.ne.s32.totalorder %s37_s22, %s816_s30  ;;  %p822_p5 = scmp.lt.s32.totalorder %s816_s30, %s816_s30 }
   0xc   :  { %p823_p6 = por %p822_p5, %p821_p4 }
   0xe   :  { %p824_p7 = pnand %p823_p6, %p817_p3 }
  0x10   :  { %827 = shalt.err (!%p824_p7)
}
  0x11   :  { %s901_s7 = smov 512   ;;  %s902_s8 = smov 32  }
  0x12   :  { %42 = dma.hbm_to_vmem [thread:$0]  %s1027_s3, 16384, %s37_s22, [#allocation7], %s901_s7, %s901_s7, %s902_s8  }
  0x13   :  { %s903_s11 = smov [#allocation3]   ;;  %s828_s15 = scalar_lea.hbm %s1026_s2, 512 }
  0x14   :  { %s24_s12 = sshll.u32 %s903_s11, 4  ;;  %p829_p8 = scmp.ne.s32.totalorder %s1026_s2, %s828_s15  ;;  %s25_s12 = int_to_ptr.vmem [resolvable:$true] %s24_s12 }
  0x15   :  { %p832_p9 = scmp.lt.u32.totalorder %s828_s15, %s1026_s2 }
  0x17   :  { %p834_p10 = pnand %p832_p9, %p829_p8 }
  0x19   :  { %837 = shalt.err (!%p834_p10)
}
  0x1a   :  { %s838_s20 = scalar_lea.vmem %s25_s12, 512  ;;  %p843_p12 = scmp.lt.s32.totalorder %s25_s12, %s25_s12 }
  0x1b   :  { %p839_p11 = scmp.ne.s32.totalorder %s25_s12, %s838_s20  ;;  %p844_p13 = scmp.lt.s32.totalorder %s838_s20, %s838_s20 }
  0x1d   :  { %p845_p0 = por %p844_p13, %p843_p12 }
  0x1f   :  { %p846_p1 = pnand %p845_p0, %p839_p11 }
  0x21   :  { %849 = shalt.err (!%p846_p1)
}
  0x22   :  { %s904_s3 = smov 256   ;;  %s905_s21 = smov 16  }
  0x23   :  { %30 = dma.hbm_to_vmem [thread:$0]  %s1026_s2, 512, %s25_s12, [#allocation4], %s904_s3, %s904_s3, %s905_s21  }
  0x24   :  { %s906_s24 = smov [#allocation8]   ;;  %s850_s28 = scalar_lea.hbm %s1028_s4, 4096 }
  0x25   :  { %s48_s25 = sshll.u32 %s906_s24, 4  ;;  %p851_p2 = scmp.ne.s32.totalorder %s1028_s4, %s850_s28  ;;  %s49_s25 = int_to_ptr.vmem [resolvable:$true] %s48_s25 }
  0x26   :  { %p854_p3 = scmp.lt.u32.totalorder %s850_s28, %s1028_s4 }
  0x28   :  { %p856_p4 = pnand %p854_p3, %p851_p2 }
  0x2a   :  { %859 = shalt.err (!%p856_p4)
}
  0x2b   :  { %s860_s9 = scalar_lea.vmem %s49_s25, 4096  ;;  %p865_p6 = scmp.lt.s32.totalorder %s49_s25, %s49_s25 }
  0x2c   :  { %p861_p5 = scmp.ne.s32.totalorder %s49_s25, %s860_s9  ;;  %p866_p7 = scmp.lt.s32.totalorder %s860_s9, %s860_s9 }
  0x2e   :  { %p867_p8 = por %p866_p7, %p865_p6 }
  0x30   :  { %p868_p9 = pnand %p867_p8, %p861_p5 }
  0x32   :  { %871 = shalt.err (!%p868_p9)
}
  0x33   :  { %s907_s2 = smov 128   ;;  %s908_s10 = smov 8  }
  0x34   :  { %54 = dma.hbm_to_vmem [thread:$0]  %s1028_s4, 4096, %s49_s25, [#allocation7], %s907_s2, %s907_s2, %s908_s10  }
  0x35   :  { %894 = dma.done.wait [#allocation4], 512  }
  0x36   :  { %895 = vsyncadd [#allocation4], 4294966784 }
  0x37   :  { %896 = dma.done.wait [#allocation7], 20480  }
  0x38   :  { %897 = vsyncadd [#allocation7], 4294946816  ;;  %v909_v0 = vmov 0.0   ;;  %v69_v1 = vld [vmem:[#allocation3 + $0x8] sm:$0xff]  ;;  %v71_v2 = vld [vmem:[#allocation3 + $0x18] sm:$0xff]  ;;  %vm84_vm0 = vcmask 130048  }
  0x39   :  { %152 = vmatprep.mubr.f32.mxu0 %v909_v0  ;;  %v68_v3 = vld [vmem:[#allocation3] sm:$0xff]  ;;  %v627_v4 = vpack.c.bf16 %v71_v2, %v69_v1  ;;  %v70_v5 = vld [vmem:[#allocation3 + $0x10] sm:$0xff]  ;;  %v162_v6 = vld [vmem:[#allocation6 + $0x8] sm:$0xff] }
  0x3a   :  { %v629_v7 = vpack.c.bf16 %v70_v5, %v68_v3  ;;  %v67_v8 = vld [vmem:[%s1025_s1] sm:$0xff]  ;;  %v164_v9 = vld [vmem:[#allocation6 + $0x28] sm:$0xff] }
  0x3b   :  { %v161_v10 = vld [vmem:[#allocation6] sm:$0xff]  ;;  %628 = vmatprep.subr.bf16.mxu0 %v627_v4  ;;  %v631_v12 = vpack.c.bf16 %v164_v9, %v162_v6  ;;  %v166_v14 = vld [vmem:[#allocation6 + $0x48] sm:$0xff] }
  0x3c   :  { %v163_v11 = vld [vmem:[#allocation6 + $0x20] sm:$0xff]  ;;  %v168_v15 = vld [vmem:[#allocation6 + $0x68] sm:$0xff]  ;;  %630 = vmatpush1.bf16.msra.mxu0 %v629_v7 }
  0x3d   :  { %v633_v13 = vpack.c.bf16 %v163_v11, %v161_v10  ;;  %v165_v16 = vld [vmem:[#allocation6 + $0x40] sm:$0xff]  ;;  %v635_v17 = vpack.c.bf16 %v168_v15, %v166_v14  ;;  %v170_v19 = vld [vmem:[#allocation6 + $0x88] sm:$0xff]  ;;  %632 = vmatprep.subr.bf16.mxu1 %v631_v12 }
  0x3e   :  { %v167_v18 = vld [vmem:[#allocation6 + $0x60] sm:$0xff]  ;;  %v172_v20 = vld [vmem:[#allocation6 + $0xa8] sm:$0xff] }
  0x3f   :  { %634 = vmatpush1.bf16.msra.mxu1 %v633_v13  ;;  %v637_v21 = vpack.c.bf16 %v167_v18, %v165_v16  ;;  %590 = vmatmul.mubr.msk.f32.vlgmr.msra.gmra.mrb[0].mxu0 %vm84_vm0, %v67_v8  ;;  %v639_v22 = vpack.c.bf16 %v172_v20, %v170_v19  ;;  %v169_v23 = vld [vmem:[#allocation6 + $0x80] sm:$0xff]  ;;  %v174_v25 = vld [vmem:[#allocation6 + $0xc8] sm:$0xff] }
  0x40   :  { %636 = vmatprep.subr.bf16.mxu1 %v635_v17  ;;  %v171_v24 = vld [vmem:[#allocation6 + $0xa0] sm:$0xff]  ;;  %v176_v26 = vld [vmem:[#allocation6 + $0xe8] sm:$0xff] }
  0x41   :  { %v641_v27 = vpack.c.bf16 %v171_v24, %v169_v23  ;;  %v643_v28 = vpack.c.bf16 %v176_v26, %v174_v25  ;;  %v173_v29 = vld [vmem:[#allocation6 + $0xc0] sm:$0xff]  ;;  %v178_v31 = vld [vmem:[#allocation6 + $0x108] sm:$0xff] }
  0x42   :  { %v175_v30 = vld [vmem:[#allocation6 + $0xe0] sm:$0xff]  ;;  %v180_v32 = vld [vmem:[#allocation6 + $0x128] sm:$0xff] }
  0x43   :  { %638 = vmatpush1.bf16.msra.mxu1 %v637_v21  ;;  %v645_v33 = vpack.c.bf16 %v175_v30, %v173_v29  ;;  %v647_v34 = vpack.c.bf16 %v180_v32, %v178_v31  ;;  %v177_v35 = vld [vmem:[#allocation6 + $0x100] sm:$0xff]  ;;  %v182_v37 = vld [vmem:[#allocation6 + $0x148] sm:$0xff] }
  0x44   :  { %640 = vmatprep.subr.bf16.mxu1 %v639_v22  ;;  %v179_v36 = vld [vmem:[#allocation6 + $0x120] sm:$0xff]  ;;  %v184_v38 = vld [vmem:[#allocation6 + $0x168] sm:$0xff] }
  0x45   :  { %v649_v39 = vpack.c.bf16 %v179_v36, %v177_v35  ;;  %v651_v40 = vpack.c.bf16 %v184_v38, %v182_v37  ;;  %v181_v41 = vld [vmem:[#allocation6 + $0x140] sm:$0xff]  ;;  %v186_v43 = vld [vmem:[#allocation6 + $0x188] sm:$0xff] }
  0x46   :  { %v183_v42 = vld [vmem:[#allocation6 + $0x160] sm:$0xff]  ;;  %v188_v44 = vld [vmem:[#allocation6 + $0x1a8] sm:$0xff] }
  0x47   :  { %642 = vmatpush1.bf16.msra.mxu1 %v641_v27  ;;  %v653_v45 = vpack.c.bf16 %v183_v42, %v181_v41  ;;  %v655_v46 = vpack.c.bf16 %v188_v44, %v186_v43  ;;  %v185_v47 = vld [vmem:[#allocation6 + $0x180] sm:$0xff]  ;;  %v190_v49 = vld [vmem:[#allocation6 + $0x1c8] sm:$0xff]  ;;  %v313_v41 = vld [vmem:[#allocation6 + $0x38] sm:$0xff] }
  0x48   :  { %644 = vmatprep.subr.bf16.mxu1 %v643_v28  ;;  %v187_v48 = vld [vmem:[#allocation6 + $0x1a0] sm:$0xff]  ;;  %v192_v50 = vld [vmem:[#allocation6 + $0x1e8] sm:$0xff]  ;;  %v310_v42 = vld [vmem:[#allocation6 + $0x10] sm:$0xff] }
  0x49   :  { %v657_v51 = vpack.c.bf16 %v187_v48, %v185_v47  ;;  %v659_v52 = vpack.c.bf16 %v192_v50, %v190_v49  ;;  %v189_v53 = vld [vmem:[#allocation6 + $0x1c0] sm:$0xff]  ;;  %v194_v55 = vld [vmem:[#allocation6 + $0x208] sm:$0xff]  ;;  %v312_v44 = vld [vmem:[#allocation6 + $0x30] sm:$0xff] }
  0x4a   :  { %v191_v54 = vld [vmem:[#allocation6 + $0x1e0] sm:$0xff]  ;;  %v196_v56 = vld [vmem:[#allocation6 + $0x228] sm:$0xff]  ;;  %v697_v47 = vpack.c.bf16 %v312_v44, %v310_v42  ;;  %v314_v49 = vld [vmem:[#allocation6 + $0x50] sm:$0xff] }
  0x4b   :  { %646 = vmatpush1.bf16.msra.mxu1 %v645_v33  ;;  %v661_v57 = vpack.c.bf16 %v191_v54, %v189_v53  ;;  %v663_v58 = vpack.c.bf16 %v196_v56, %v194_v55  ;;  %v193_v59 = vld [vmem:[#allocation6 + $0x200] sm:$0xff]  ;;  %v198_v61 = vld [vmem:[#allocation6 + $0x248] sm:$0xff]  ;;  %v316_v50 = vld [vmem:[#allocation6 + $0x70] sm:$0xff] }
  0x4c   :  { %648 = vmatprep.subr.bf16.mxu1 %v647_v34  ;;  %v195_v60 = vld [vmem:[#allocation6 + $0x220] sm:$0xff]  ;;  %v200_v62 = vld [vmem:[#allocation6 + $0x268] sm:$0xff]  ;;  %v701_v53 = vpack.c.bf16 %v316_v50, %v314_v49  ;;  %v318_v55 = vld [vmem:[#allocation6 + $0x90] sm:$0xff] }
  0x4d   :  { %v665_v63 = vpack.c.bf16 %v195_v60, %v193_v59  ;;  %v667_v0 = vpack.c.bf16 %v200_v62, %v198_v61  ;;  %v197_v1 = vld [vmem:[#allocation6 + $0x240] sm:$0xff]  ;;  %v202_v3 = vld [vmem:[#allocation6 + $0x288] sm:$0xff]  ;;  %v320_v56 = vld [vmem:[#allocation6 + $0xb0] sm:$0xff] }
  0x4e   :  { %v199_v2 = vld [vmem:[#allocation6 + $0x260] sm:$0xff]  ;;  %v204_v4 = vld [vmem:[#allocation6 + $0x2a8] sm:$0xff]  ;;  %v705_v59 = vpack.c.bf16 %v320_v56, %v318_v55  ;;  %v322_v61 = vld [vmem:[#allocation6 + $0xd0] sm:$0xff] }
  0x4f   :  { %650 = vmatpush1.bf16.msra.mxu1 %v649_v39  ;;  %v669_v5 = vpack.c.bf16 %v199_v2, %v197_v1  ;;  %v671_v6 = vpack.c.bf16 %v204_v4, %v202_v3  ;;  %v201_v7 = vld [vmem:[#allocation6 + $0x280] sm:$0xff]  ;;  %v206_v9 = vld [vmem:[#allocation6 + $0x2c8] sm:$0xff]  ;;  %v324_v62 = vld [vmem:[#allocation6 + $0xf0] sm:$0xff] }
  0x50   :  { %652 = vmatprep.subr.bf16.mxu1 %v651_v40  ;;  %v203_v8 = vld [vmem:[#allocation6 + $0x2a0] sm:$0xff]  ;;  %v208_v10 = vld [vmem:[#allocation6 + $0x2e8] sm:$0xff]  ;;  %v311_v40 = vld [vmem:[#allocation6 + $0x18] sm:$0xff]  ;;  %v709_v1 = vpack.c.bf16 %v324_v62, %v322_v61 }
  0x51   :  { %v673_v11 = vpack.c.bf16 %v203_v8, %v201_v7  ;;  %v675_v12 = vpack.c.bf16 %v208_v10, %v206_v9  ;;  %v205_v13 = vld [vmem:[#allocation6 + $0x2c0] sm:$0xff]  ;;  %v210_v15 = vld [vmem:[#allocation6 + $0x308] sm:$0xff]  ;;  %v695_v43 = vpack.c.bf16 %v313_v41, %v311_v40  ;;  %v326_v3 = vld [vmem:[#allocation6 + $0x110] sm:$0xff] }
  0x52   :  { %v207_v14 = vld [vmem:[#allocation6 + $0x2e0] sm:$0xff]  ;;  %v212_v16 = vld [vmem:[#allocation6 + $0x328] sm:$0xff]  ;;  %v328_v4 = vld [vmem:[#allocation6 + $0x130] sm:$0xff] }
  0x53   :  { %654 = vmatpush1.bf16.msra.mxu1 %v653_v45  ;;  %v677_v17 = vpack.c.bf16 %v207_v14, %v205_v13  ;;  %v679_v18 = vpack.c.bf16 %v212_v16, %v210_v15  ;;  %v209_v19 = vld [vmem:[#allocation6 + $0x300] sm:$0xff]  ;;  %v214_v21 = vld [vmem:[#allocation6 + $0x348] sm:$0xff]  ;;  %v315_v45 = vld [vmem:[#allocation6 + $0x58] sm:$0xff]  ;;  %696 = vmatprep.subr.bf16.mxu0 %v695_v43  ;;  %v713_v7 = vpack.c.bf16 %v328_v4, %v326_v3 }
  0x54   :  { %656 = vmatprep.subr.bf16.mxu1 %v655_v46  ;;  %v211_v20 = vld [vmem:[#allocation6 + $0x320] sm:$0xff]  ;;  %v216_v22 = vld [vmem:[#allocation6 + $0x368] sm:$0xff]  ;;  %v317_v46 = vld [vmem:[#allocation6 + $0x78] sm:$0xff]  ;;  %698 = vmatpush1.bf16.msra.mxu0 %v697_v47 }
  0x55   :  { %v681_v23 = vpack.c.bf16 %v211_v20, %v209_v19  ;;  %v683_v24 = vpack.c.bf16 %v216_v22, %v214_v21  ;;  %v213_v25 = vld [vmem:[#allocation6 + $0x340] sm:$0xff]  ;;  %v218_v27 = vld [vmem:[#allocation6 + $0x388] sm:$0xff]  ;;  %v699_v48 = vpack.c.bf16 %v317_v46, %v315_v45  ;;  %v330_v9 = vld [vmem:[#allocation6 + $0x150] sm:$0xff] }
  0x56   :  { %v215_v26 = vld [vmem:[#allocation6 + $0x360] sm:$0xff]  ;;  %v220_v28 = vld [vmem:[#allocation6 + $0x3a8] sm:$0xff]  ;;  %v332_v10 = vld [vmem:[#allocation6 + $0x170] sm:$0xff] }
  0x57   :  { %658 = vmatpush1.bf16.msra.mxu1 %v657_v51  ;;  %v685_v29 = vpack.c.bf16 %v215_v26, %v213_v25  ;;  %v687_v30 = vpack.c.bf16 %v220_v28, %v218_v27  ;;  %v217_v31 = vld [vmem:[#allocation6 + $0x380] sm:$0xff]  ;;  %v222_v34 = vld [vmem:[#allocation6 + $0x3c8] sm:$0xff]  ;;  %v319_v51 = vld [vmem:[#allocation6 + $0x98] sm:$0xff]  ;;  %700 = vmatprep.subr.bf16.mxu0 %v699_v48  ;;  %v717_v13 = vpack.c.bf16 %v332_v10, %v330_v9 }
  0x58   :  { %660 = vmatprep.subr.bf16.mxu1 %v659_v52  ;;  %v219_v32 = vld [vmem:[#allocation6 + $0x3a0] sm:$0xff]  ;;  %v224_v35 = vld [vmem:[#allocation6 + $0x3e8] sm:$0xff]  ;;  %v321_v52 = vld [vmem:[#allocation6 + $0xb8] sm:$0xff]  ;;  %702 = vmatpush1.bf16.msra.mxu0 %v701_v53 }
  0x59   :  { %v689_v33 = vpack.c.bf16 %v219_v32, %v217_v31  ;;  %v691_v36 = vpack.c.bf16 %v224_v35, %v222_v34  ;;  %v221_v37 = vld [vmem:[#allocation6 + $0x3c0] sm:$0xff]  ;;  %v703_v54 = vpack.c.bf16 %v321_v52, %v319_v51  ;;  %v334_v15 = vld [vmem:[#allocation6 + $0x190] sm:$0xff]  ;;  %v351_v35 = vld [vmem:[#allocation6 + $0x298] sm:$0xff] }
  0x5a   :  { %v223_v38 = vld [vmem:[#allocation6 + $0x3e0] sm:$0xff]  ;;  %v336_v16 = vld [vmem:[#allocation6 + $0x1b0] sm:$0xff]  ;;  %v355_v41 = vld [vmem:[#allocation6 + $0x2d8] sm:$0xff] }
  0x5b   :  { %662 = vmatpush1.bf16.msra.mxu1 %v661_v57  ;;  %v693_v39 = vpack.c.bf16 %v223_v38, %v221_v37  ;;  %v323_v57 = vld [vmem:[#allocation6 + $0xd8] sm:$0xff]  ;;  %704 = vmatprep.subr.bf16.mxu0 %v703_v54  ;;  %v721_v19 = vpack.c.bf16 %v336_v16, %v334_v15  ;;  %v338_v21 = vld [vmem:[#allocation6 + $0x1d0] sm:$0xff] }
  0x5c   :  { %664 = vmatprep.subr.bf16.mxu1 %v663_v58  ;;  %v325_v58 = vld [vmem:[#allocation6 + $0xf8] sm:$0xff]  ;;  %706 = vmatpush1.bf16.msra.mxu0 %v705_v59  ;;  %v340_v22 = vld [vmem:[#allocation6 + $0x1f0] sm:$0xff] }
  0x5d   :  { %v707_v60 = vpack.c.bf16 %v325_v58, %v323_v57  ;;  %v725_v25 = vpack.c.bf16 %v340_v22, %v338_v21  ;;  %v342_v27 = vld [vmem:[#allocation6 + $0x210] sm:$0xff]  ;;  %v357_v42 = vld [vmem:[#allocation6 + $0x2f8] sm:$0xff]  ;;  %v475_v21 = vld [vmem:[#allocation8 + $0x80] sm:$0xff] }
  0x5e   :  { %v344_v28 = vld [vmem:[#allocation6 + $0x230] sm:$0xff]  ;;  %v739_v44 = vpack.c.bf16 %v357_v42, %v355_v41  ;;  %v359_v47 = vld [vmem:[#allocation6 + $0x318] sm:$0xff]  ;;  %v476_v22 = vld [vmem:[#allocation8 + $0x88] sm:$0xff] }
  0x5f   :  { %666 = vmatpush1.bf16.msra.mxu1 %v665_v63  ;;  %v327_v63 = vld [vmem:[#allocation6 + $0x118] sm:$0xff]  ;;  %708 = vmatprep.subr.bf16.mxu0 %v707_v60  ;;  %v729_v31 = vpack.c.bf16 %v344_v28, %v342_v27  ;;  %v348_v34 = vld [vmem:[#allocation6 + $0x270] sm:$0xff] }
  0x60   :  { %668 = vmatprep.subr.bf16.mxu1 %v667_v0  ;;  %v329_v0 = vld [vmem:[#allocation6 + $0x138] sm:$0xff]  ;;  %710 = vmatpush1.bf16.msra.mxu0 %v709_v1  ;;  %v352_v40 = vld [vmem:[#allocation6 + $0x2b0] sm:$0xff] }
  0x61   :  { %v711_v2 = vpack.c.bf16 %v329_v0, %v327_v63  ;;  %v354_v45 = vld [vmem:[#allocation6 + $0x2d0] sm:$0xff]  ;;  %v361_v48 = vld [vmem:[#allocation6 + $0x338] sm:$0xff]  ;;  %v74_v63 = vlaneseq }
  0x62   :  { %v356_v46 = vld [vmem:[#allocation6 + $0x2f0] sm:$0xff]  ;;  %v743_v50 = vpack.c.bf16 %v361_v48, %v359_v47  ;;  %v363_v53 = vld [vmem:[#allocation6 + $0x358] sm:$0xff]  ;;  %v467_v48 = vld [vmem:[#allocation8 + $0x40] sm:$0xff] }
  0x63   :  { %670 = vmatpush1.bf16.msra.mxu1 %v669_v5  ;;  %v331_v5 = vld [vmem:[#allocation6 + $0x158] sm:$0xff]  ;;  %712 = vmatprep.subr.bf16.mxu0 %v711_v2  ;;  %v741_v49 = vpack.c.bf16 %v356_v46, %v354_v45  ;;  %v358_v51 = vld [vmem:[#allocation6 + $0x310] sm:$0xff]  ;;  %v75_v0 = vshrl.u32 %v74_v63, 7  ;;  %v72_v2 = vld [vmem:[%s1029_s5] sm:$0x3] }
  0x64   :  { %672 = vmatprep.subr.bf16.mxu1 %v671_v6  ;;  %v333_v6 = vld [vmem:[#allocation6 + $0x178] sm:$0xff]  ;;  %714 = vmatpush1.bf16.msra.mxu0 %v713_v7  ;;  %v360_v52 = vld [vmem:[#allocation6 + $0x330] sm:$0xff]  ;;  %v484_v45 = vld [vmem:[#allocation8 + $0xc8] sm:$0xff] }
  0x65   :  { %v715_v8 = vpack.c.bf16 %v333_v6, %v331_v5  ;;  %v365_v54 = vld [vmem:[#allocation6 + $0x378] sm:$0xff]  ;;  %v745_v55 = vpack.c.bf16 %v360_v52, %v358_v51  ;;  %v362_v57 = vld [vmem:[#allocation6 + $0x350] sm:$0xff]  ;;  %v987_v1 = vsub.s32 0, %v75_v0  ;;  %v992_v3 = vsub.s32 1, %v75_v0 }
  0x66   :  { %v747_v56 = vpack.c.bf16 %v365_v54, %v363_v53  ;;  %v364_v58 = vld [vmem:[#allocation6 + $0x370] sm:$0xff]  ;;  %v367_v59 = vld [vmem:[#allocation6 + $0x398] sm:$0xff] }
  0x67   :  { %674 = vmatpush1.bf16.msra.mxu1 %v673_v11  ;;  %v335_v11 = vld [vmem:[#allocation6 + $0x198] sm:$0xff]  ;;  %716 = vmatprep.subr.bf16.mxu0 %v715_v8  ;;  %v749_v61 = vpack.c.bf16 %v364_v58, %v362_v57  ;;  %v77_v4 = vrot.slane %v72_v2, %v987_v1  ;;  %v81_v5 = vrot.slane %v72_v2, %v992_v3  ;;  %v465_v42 = vld [vmem:[#allocation8 + $0x30] sm:$0xff]  ;;  %v488_v57 = vld [vmem:[#allocation8 + $0xe8] sm:$0xff] }
  0x68   :  { %676 = vmatprep.subr.bf16.mxu1 %v675_v12  ;;  %v337_v12 = vld [vmem:[#allocation6 + $0x1b8] sm:$0xff]  ;;  %718 = vmatpush1.bf16.msra.mxu0 %v717_v13  ;;  %v368_v13 = vld [vmem:[#allocation6 + $0x3b0] sm:$0xff] }
  0x69   :  { %v719_v14 = vpack.c.bf16 %v337_v12, %v335_v11  ;;  %v369_v60 = vld [vmem:[#allocation6 + $0x3b8] sm:$0xff]  ;;  %v366_v12 = vld [vmem:[#allocation6 + $0x390] sm:$0xff] }
  0x6a   :  { %v751_v62 = vpack.c.bf16 %v369_v60, %v367_v59  ;;  %v371_v15 = vld [vmem:[#allocation6 + $0x3d8] sm:$0xff]  ;;  %v469_v54 = vld [vmem:[#allocation8 + $0x50] sm:$0xff]  ;;  %v225_v60 = vld [vmem:[%s1029_s5 + $0x2] sm:$0x3] }
  0x6b   :  { %678 = vmatpush1.bf16.msra.mxu1 %v677_v17  ;;  %v339_v17 = vld [vmem:[#allocation6 + $0x1d8] sm:$0xff]  ;;  %720 = vmatprep.subr.bf16.mxu0 %v719_v14  ;;  %v753_v14 = vpack.c.bf16 %v368_v13, %v366_v12  ;;  %v473_v13 = vld [vmem:[#allocation8 + $0x70] sm:$0xff] }
  0x6c   :  { %680 = vmatprep.subr.bf16.mxu1 %v679_v18  ;;  %v341_v18 = vld [vmem:[#allocation6 + $0x1f8] sm:$0xff]  ;;  %722 = vmatpush1.bf16.msra.mxu0 %v721_v19  ;;  %v372_v19 = vld [vmem:[#allocation6 + $0x3f0] sm:$0xff] }
  0x6d   :  { %v723_v20 = vpack.c.bf16 %v341_v18, %v339_v17  ;;  %v373_v16 = vld [vmem:[#allocation6 + $0x3f8] sm:$0xff]  ;;  %v370_v18 = vld [vmem:[#allocation6 + $0x3d0] sm:$0xff] }
  0x6e   :  { %v755_v17 = vpack.c.bf16 %v373_v16, %v371_v15  ;;  %v478_v27 = vld [vmem:[#allocation8 + $0x98] sm:$0xff]  ;;  %v374_v16 = vld [vmem:[%s1029_s5 + $0x4] sm:$0x3] }
  0x6f   :  { %682 = vmatpush1.bf16.msra.mxu1 %v681_v23  ;;  %v343_v23 = vld [vmem:[#allocation6 + $0x218] sm:$0xff]  ;;  %724 = vmatprep.subr.bf16.mxu0 %v723_v20  ;;  %v757_v20 = vpack.c.bf16 %v372_v19, %v370_v18  ;;  %v383_v18 = vrot.slane %v374_v16, %v992_v3 }
  0x70   :  { %684 = vmatprep.subr.bf16.mxu1 %v683_v24  ;;  %v345_v24 = vld [vmem:[#allocation6 + $0x238] sm:$0xff]  ;;  %726 = vmatpush1.bf16.msra.mxu0 %v725_v25  ;;  %v460_v25 = vld [vmem:[#allocation8 + $0x8] sm:$0xff] }
  0x71   :  { %v727_v26 = vpack.c.bf16 %v345_v24, %v343_v23  ;;  %v459_v23 = vld [vmem:[#allocation8] sm:$0xff]  ;;  %v759_v24 = vpack.c.bf16 %v476_v22, %v475_v21  ;;  %v486_v51 = vld [vmem:[#allocation8 + $0xd8] sm:$0xff] }
  0x72   :  { %v761_v28 = vpack.c.bf16 %v460_v25, %v459_v23 }
  0x73   :  { %686 = vmatpush1.bf16.msra.mxu1 %v685_v29  ;;  %v347_v29 = vld [vmem:[#allocation6 + $0x258] sm:$0xff]  ;;  %728 = vmatprep.subr.bf16.mxu0 %v727_v26  ;;  %v477_v26 = vld [vmem:[#allocation8 + $0x90] sm:$0xff] }
  0x74   :  { %688 = vmatprep.subr.bf16.mxu1 %v687_v30  ;;  %v349_v30 = vld [vmem:[#allocation6 + $0x278] sm:$0xff]  ;;  %730 = vmatpush1.bf16.msra.mxu0 %v729_v31 }
  0x75   :  { %v731_v32 = vpack.c.bf16 %v349_v30, %v347_v29  ;;  %v763_v29 = vpack.c.bf16 %v478_v27, %v477_v26  ;;  %v461_v30 = vld [vmem:[#allocation8 + $0x10] sm:$0xff]  ;;  %v462_v31 = vld [vmem:[#allocation8 + $0x18] sm:$0xff]  ;;  %v591_v26 = vld [vmem:[%s1029_s5 + $0x6] ss:$0 sm:$0xff] }
  0x77   :  { %690 = vmatpush1.bf16.msra.mxu1 %v689_v33  ;;  %v346_v33 = vld [vmem:[#allocation6 + $0x250] sm:$0xff]  ;;  %732 = vmatprep.subr.bf16.mxu0 %v731_v32  ;;  %v479_v32 = vld [vmem:[#allocation8 + $0xa0] sm:$0xff] }
  0x78   :  { %692 = vmatprep.subr.bf16.mxu1 %v691_v36  ;;  %v353_v36 = vld [vmem:[#allocation6 + $0x2b8] sm:$0xff]  ;;  %v733_v37 = vpack.c.bf16 %v348_v34, %v346_v33  ;;  %v480_v33 = vld [vmem:[#allocation8 + $0xa8] sm:$0xff]  ;;  %v765_v34 = vpack.c.bf16 %v462_v31, %v461_v30 }
  0x79   :  { %v735_v38 = vpack.c.bf16 %v353_v36, %v351_v35  ;;  %v767_v35 = vpack.c.bf16 %v480_v33, %v479_v32  ;;  %v463_v36 = vld [vmem:[#allocation8 + $0x20] sm:$0xff] }
  0x7a   :  { %734 = vmatpush1.bf16.msra.mxu0 %v733_v37  ;;  %v464_v37 = vld [vmem:[#allocation8 + $0x28] sm:$0xff] }
  0x7b   :  { %694 = vmatpush1.bf16.msra.mxu1 %v693_v39  ;;  %v350_v39 = vld [vmem:[#allocation6 + $0x290] sm:$0xff]  ;;  %736 = vmatprep.subr.bf16.mxu0 %v735_v38 }
  0x7c   :  { %v737_v43 = vpack.c.bf16 %v352_v40, %v350_v39  ;;  %760 = vmatprep.subr.bf16.mxu1 %v759_v24  ;;  %v481_v38 = vld [vmem:[#allocation8 + $0xb0] sm:$0xff]  ;;  %v482_v39 = vld [vmem:[#allocation8 + $0xb8] sm:$0xff]  ;;  %v769_v40 = vpack.c.bf16 %v464_v37, %v463_v36 }
  0x7d   :  { %v771_v41 = vpack.c.bf16 %v482_v39, %v481_v38 }
  0x7e   :  { %738 = vmatpush1.bf16.msra.mxu0 %v737_v43  ;;  %v466_v43 = vld [vmem:[#allocation8 + $0x38] sm:$0xff] }
  0x7f   :  { %740 = vmatprep.subr.bf16.mxu0 %v739_v44  ;;  %v483_v44 = vld [vmem:[#allocation8 + $0xc0] sm:$0xff]  ;;  %v773_v46 = vpack.c.bf16 %v466_v43, %v465_v42 }
  0x80   :  { %v775_v47 = vpack.c.bf16 %v484_v45, %v483_v44 }
  0x82   :  { %742 = vmatpush1.bf16.msra.mxu0 %v741_v49  ;;  %v468_v49 = vld [vmem:[#allocation8 + $0x48] sm:$0xff] }
  0x83   :  { %744 = vmatprep.subr.bf16.mxu0 %v743_v50  ;;  %v485_v50 = vld [vmem:[#allocation8 + $0xd0] sm:$0xff]  ;;  %v777_v52 = vpack.c.bf16 %v468_v49, %v467_v48 }
  0x84   :  { %v779_v53 = vpack.c.bf16 %v486_v51, %v485_v50 }
  0x86   :  { %746 = vmatpush1.bf16.msra.mxu0 %v745_v55  ;;  %v470_v55 = vld [vmem:[#allocation8 + $0x58] sm:$0xff] }
  0x87   :  { %748 = vmatprep.subr.bf16.mxu0 %v747_v56  ;;  %v487_v56 = vld [vmem:[#allocation8 + $0xe0] sm:$0xff]  ;;  %v781_v58 = vpack.c.bf16 %v470_v55, %v469_v54 }
  0x88   :  { %v783_v59 = vpack.c.bf16 %v488_v57, %v487_v56 }
  0x8a   :  { %750 = vmatpush1.bf16.msra.mxu0 %v749_v61  ;;  %v230_v61 = vrot.slane %v225_v60, %v987_v1 }
  0x8b   :  { %752 = vmatprep.subr.bf16.mxu0 %v751_v62  ;;  %v234_v62 = vrot.slane %v225_v60, %v992_v3 }
  0x8e   :  { %754 = vmatpush1.bf16.msra.mxu0 %v753_v14  ;;  %v474_v14 = vld [vmem:[#allocation8 + $0x78] sm:$0xff] }
  0x8f   :  { %756 = vmatprep.subr.bf16.mxu0 %v755_v17  ;;  %v789_v15 = vpack.c.bf16 %v474_v14, %v473_v13  ;;  %v379_v17 = vrot.slane %v374_v16, %v987_v1  ;;  %v569_v1 = vstv %s1024_s0 }
  0x92   :  { %758 = vmatpush1.bf16.msra.mxu0 %v757_v20 }
 0x112   :  { %v154_v6 = vpop.f32.mrb[0].mxu0 }
 0x113   :  { %v155_v7 = vadd.f32 %v154_v6, %v77_v4  ;;  %v156_v8 = vpop.f32.mrb[1].mxu0 }
 0x114   :  { %v157_v9 = vadd.f32 %v156_v8, %v81_v5  ;;  %v472_v8 = vld [vmem:[#allocation8 + $0x68] sm:$0xff] }
 0x115   :  { %v159_v11 = vmax.f32 %v155_v7, 0.0  ;;  %v471_v7 = vld [vmem:[#allocation8 + $0x60] sm:$0xff] }
 0x116   :  { %v160_v10 = vmax.f32 %v157_v9, 0.0  ;;  %v785_v9 = vpack.c.bf16 %v472_v8, %v471_v7 }
 0x118   :  { %301 = vmatprep.mubr.f32.mxu1 %v160_v10  ;;  %v489_v10 = vld [vmem:[#allocation8 + $0xf0] sm:$0xff] }
 0x119   :  { %302 = vmatmul.mubr.f32.vlgmr.msra.gmra.mrb[0].mxu1 %v159_v11  ;;  %v490_v11 = vld [vmem:[#allocation8 + $0xf8] sm:$0xff] }
 0x11a   :  { %762 = vmatpush3.bf16.msra.mxu1 %v761_v28  ;;  %v787_v12 = vpack.c.bf16 %v490_v11, %v489_v10 }
 0x11b   :  { %764 = vmatprep.subr.bf16.mxu1 %v763_v29 }
 0x11e   :  { %766 = vmatpush3.bf16.msra.mxu1 %v765_v34 }
 0x11f   :  { %768 = vmatprep.subr.bf16.mxu1 %v767_v35 }
 0x122   :  { %770 = vmatpush3.bf16.msra.mxu1 %v769_v40 }
 0x123   :  { %772 = vmatprep.subr.bf16.mxu1 %v771_v41 }
 0x126   :  { %774 = vmatpush3.bf16.msra.mxu1 %v773_v46 }
 0x127   :  { %776 = vmatprep.subr.bf16.mxu1 %v775_v47 }
 0x12a   :  { %778 = vmatpush3.bf16.msra.mxu1 %v777_v52 }
 0x12b   :  { %780 = vmatprep.subr.bf16.mxu1 %v779_v53 }
 0x12e   :  { %782 = vmatpush3.bf16.msra.mxu1 %v781_v58 }
 0x12f   :  { %784 = vmatprep.subr.bf16.mxu1 %v783_v59 }
 0x132   :  { %786 = vmatpush3.bf16.msra.mxu1 %v785_v9 }
 0x133   :  { %788 = vmatprep.subr.bf16.mxu1 %v787_v12 }
 0x136   :  { %790 = vmatpush3.bf16.msra.mxu1 %v789_v15 }
 0x1ec   :  { %v303_v63 = vpop.f32.mrb[0].mxu1 }
 0x1ed   :  { %v304_v0 = vadd.f32 %v303_v63, %v230_v61  ;;  %v305_v2 = vpop.f32.mrb[1].mxu1 }
 0x1ee   :  { %v306_v4 = vadd.f32 %v305_v2, %v234_v62 }
 0x1ef   :  { %v308_v6 = vmax.f32 %v304_v0, 0.0 }
 0x1f0   :  { %v309_v5 = vmax.f32 %v306_v4, 0.0 }
 0x1f2   :  { %450 = vmatprep.mubr.f32.mxu0 %v309_v5 }
 0x1f3   :  { %451 = vmatmul.mubr.f32.vlgmr.msra.gmra.mrb[2].mxu0 %v308_v6 }
 0x2c6   :  { %v452_v19 = vpop.f32.mrb[2].mxu0 }
 0x2c7   :  { %v453_v20 = vadd.f32 %v452_v19, %v379_v17  ;;  %v454_v21 = vpop.f32.mrb[3].mxu0 }
 0x2c8   :  { %v455_v22 = vadd.f32 %v454_v21, %v383_v18 }
 0x2c9   :  { %v457_v24 = vmax.f32 %v453_v20, 0.0 }
 0x2ca   :  { %v458_v23 = vmax.f32 %v455_v22, 0.0 }
 0x2cc   :  { %562 = vmatprep.mubr.f32.mxu1 %v458_v23 }
 0x2cd   :  { %563 = vmatmul.mubr.f32.vlgmr.msra.gmra.mrb[2].mxu1 %v457_v24 }
 0x3a0   :  { %v624_v25 = vpop.f32.mrb[2].mxu1 }
 0x3a1   :  { %v625_v27 = vpop.f32.mrb[3].mxu1 }
 0x3a2   :  { %v626_v28 = vadd.f32 %v625_v27, %v624_v25 }
 0x3a4   :  { %v565_v29 = vadd.f32 %v626_v28, %v591_v26 }
 0x3a6   :  { %804 = vtanh.f32 %v565_v29 }
 0x3b0   :  { %v805_v3 = vpop.eup %804 }
 0x3b1   :  { %v570_v30 = vmul.f32 %v805_v3, %v569_v1 }
 0x3b3   :  { %571 = vst [vmem:[#allocation9] sm:$0xff] %v570_v30 }
 0x3b4   :  { %576 = vsyncadd [#allocation5], 64  ;;  %s910_s22 = smov [#allocation9]  }
 0x3b5   :  { %s577_s23 = sshll.u32 %s910_s22, 4  ;;  %s578_s23 = int_to_ptr.vmem [resolvable:$true] %s577_s23 }
 0x3b6   :  { %s872_s24 = scalar_lea.vmem %s578_s23, 64  ;;  %s876_s25 = scalar_lea.vmem %s578_s23, 128 }
 0x3b7   :  { %p873_p10 = scmp.ne.s32.totalorder %s578_s23, %s872_s24  ;;  %p877_p11 = scmp.lt.s32.totalorder %s578_s23, %s578_s23 }
 0x3b8   :  { %p878_p12 = scmp.lt.s32.totalorder %s876_s25, %s872_s24 }
 0x3ba   :  { %p879_p13 = por %p878_p12, %p877_p11 }
 0x3bc   :  { %p880_p0 = pnand %p879_p13, %p873_p10 }
 0x3be   :  { %883 = shalt.err (!%p880_p0)
}
 0x3bf   :  { %s884_s27 = scalar_lea.hbm %s1030_s6, 64 }
 0x3c0   :  { %p885_p1 = scmp.ne.s32.totalorder %s1030_s6, %s884_s27  ;;  %p888_p2 = scmp.lt.u32.totalorder %s884_s27, %s1030_s6 }
 0x3c2   :  { %p890_p3 = pnand %p888_p2, %p885_p1 }
 0x3c4   :  { %893 = shalt.err (!%p890_p3)
}
 0x3c5   :  { %s911_s7 = smov 64   ;;  %s912_s8 = smov 4  }
 0x3c6   :  { %583 = dma.vmem_to_hbm [thread:$0]  %s578_s23, 64, %s1030_s6, [#allocation5], %s911_s7, %s911_s7, %s912_s8  }
 0x3c7   :  { %898 = dma.done.wait [#allocation5], 128  }
 0x3c8   :  { %899 = vsyncadd [#allocation5], 4294967168 }
 0x3c9   :  { %587 = vsyncpa [#allocation4], 1 }
 0x3ca   :  { %588 = vsyncpa [#allocation7], 1 }
 0x3cb   :  { %589 = vsyncpa [#allocation5], 1 }

</bundles_post_ra>
